<compile_context>
chip_gen: v7x
topology: tpu7x:2x2x1
jax: 0.10.0
libtpu: 0.0.40
codegen_flags: <defaults>
</compile_context>

<pallas_src>
import jax
import jax.numpy as jnp
from jax.experimental import pallas as pl
from jax.experimental.pallas import tpu as pltpu

_LANE = 128                      # vreg lane width
_SUBLANE_PACK = 32               # tile rows multiple of 32: keeps bf16/int8 packing intact
_TARGET_BLOCK_BYTES = 4 << 20    # ~4 MiB per block; in+out double-buffered ~= 16 MiB
_SPLIT_ROWS = 512                # mid-size tensors: split so v7x's 2 TCs both get a tile


def _round_up(n, m):
    return ((n + m - 1) // m) * m


def _zero_mul_kernel(x_ref, o_ref):
    # Elementwise multiply-by-zero: keeps dtype and propagates NaN/inf (and -0.0)
    # exactly like torch Tensor.mul(0.0).  Do NOT replace with a memset.
    o_ref[...] = x_ref[...] * jnp.zeros((), dtype=o_ref.dtype)


def _row_tile(rows, itemsize):
    """Row-tile height for a (rows, 128) lane-dense view."""
    max_rows = max(
        _SUBLANE_PACK,
        (_TARGET_BLOCK_BYTES // (_LANE * itemsize)) // _SUBLANE_PACK * _SUBLANE_PACK,
    )
    if rows > max_rows:
        return max_rows                       # big tensors: ~4 MiB blocks; ragged tail masked
    if rows >= _SPLIT_ROWS:
        # mid-size: guarantee >= 2 grid steps so "parallel" can use both v7x TensorCores
        return min(rows, _round_up(pl.cdiv(rows, 2), _SUBLANE_PACK))
    return rows                               # small: single full-extent block (always legal)


def _zero_mul(x):
    """out = x * 0.0 via a lane-dense, row-tiled Pallas kernel."""
    shape, dtype = x.shape, x.dtype
    total = int(x.size)
    if total == 0:
        return jnp.zeros(shape, dtype)
    itemsize = jnp.dtype(dtype).itemsize

    flat = x.reshape(total)                   # contiguous reshape: no data movement
    pad = (-total) % _LANE
    if pad:
        # Ragged sizes: pad to a lane multiple, run the tiled path, slice back.
        # (Replaces the old (1, total) single-block fallback that could blow VMEM.)
        flat = jnp.pad(flat, (0, pad))
    rows = (total + pad) // _LANE
    x2 = flat.reshape(rows, _LANE)

    tm = _row_tile(rows, itemsize)
    nbytes = rows * _LANE * itemsize
    out = pl.pallas_call(
        _zero_mul_kernel,
        out_shape=jax.ShapeDtypeStruct((rows, _LANE), dtype),
        grid=(pl.cdiv(rows, tm),),
        in_specs=[pl.BlockSpec((tm, _LANE), lambda i: (i, 0))],
        out_specs=pl.BlockSpec((tm, _LANE), lambda i: (i, 0)),
        compiler_params=pltpu.CompilerParams(
            dimension_semantics=("parallel",),
            vmem_limit_bytes=32 << 20,
        ),
        cost_estimate=pl.CostEstimate(
            flops=rows * _LANE, transcendentals=0, bytes_accessed=2 * nbytes),
    )(x2)

    out = out.reshape(rows * _LANE)
    if pad:
        out = out[:total]
    return out.reshape(shape)


def zero_forward(x, stride=1):
    """Pallas implementation of NASlib Zero.forward."""
    stride = int(stride)
    if stride == 1:
        return _zero_mul(x)
    assert x.ndim == 4, "stride > 1 path assumes NCHW input (matches NASlib usage)"
    # TODO(synk): the ::stride spatial subsample stays an XLA strided slice feeding the kernel
    # (a lane-dim strided gather has no clean/portable Mosaic lowering); the sliced intermediate
    # is only 1/stride^2 of the input, so the extra traffic is small.
    xs = x[:, :, ::stride, ::stride]
    return _zero_mul(xs)


if __name__ == "__main__":
    key = jax.random.PRNGKey(0)
    N, C, H, W = 2, 4, 16, 16
    x = jax.random.normal(key, (N, C, H, W), dtype=jnp.float32)

    # stride == 1 branch: out = x * 0, same shape
    out1 = jax.block_until_ready(zero_forward(x, stride=1))
    ref1 = x * 0.0
    assert out1.shape == x.shape, out1.shape
    assert out1.dtype == x.dtype, out1.dtype
    assert jnp.array_equal(out1, ref1), float(jnp.max(jnp.abs(out1 - ref1)))

    # stride == 2 branch: out = x[:, :, ::2, ::2] * 0
    out2 = jax.block_until_ready(zero_forward(x, stride=2))
    ref2 = x[:, :, ::2, ::2] * 0.0
    assert out2.shape == (N, C, H // 2, W // 2), out2.shape
    assert out2.dtype == x.dtype, out2.dtype
    assert jnp.array_equal(out2, ref2), float(jnp.max(jnp.abs(out2 - ref2)))

    # ragged element count (exercises the pad + tiled path instead of a (1,total) block)
    xr = jax.random.normal(jax.random.PRNGKey(1), (3, 5, 7, 9), dtype=jnp.float32)
    out3 = jax.block_until_ready(zero_forward(xr, stride=1))
    assert out3.shape == xr.shape and out3.dtype == xr.dtype
    assert jnp.array_equal(out3, xr * 0.0)

    # NaN / inf propagate exactly like torch .mul(0.0)
    xn = x.at[0, 0, 0, 0].set(jnp.nan).at[0, 0, 0, 1].set(jnp.inf)
    out4 = jax.block_until_ready(zero_forward(xn, stride=1))
    assert bool(jnp.isnan(out4[0, 0, 0, 0])) and bool(jnp.isnan(out4[0, 0, 0, 1]))
    assert bool(jnp.all(out4[1:] == 0.0))

    print("KERNEL_OK")
</pallas_src>

<mosaic_0001>
module attributes {stable_mosaic.version = 11 : i64} {
  func.func @_zero_mul_kernel(%arg0: i32, %arg1: memref<16x128xf32, #tpu.memory_space<vmem>>, %arg2: memref<16x128xf32, #tpu.memory_space<vmem>>) attributes {dimension_semantics = [#tpu.dimension_semantics<parallel>], iteration_bounds = array<i64: 1>, scalar_prefetch = 0 : i64, scratch_operands = 0 : i64, tpu.core_type = #tpu.core_type<tc>, window_params = [{transform_indices = @transform_0, window_bounds = array<i64: 16, 128>}, {transform_indices = @transform_1, window_bounds = array<i64: 16, 128>}]} {
    %c0 = arith.constant 0 : index
    %c0_0 = arith.constant 0 : index
    %0 = vector.load %arg1[%c0, %c0_0] : memref<16x128xf32, #tpu.memory_space<vmem>>, vector<16x128xf32>
    %cst = arith.constant 0.000000e+00 : f32
    %1 = vector.broadcast %cst : f32 to vector<16x128xf32>
    %2 = arith.mulf %0, %1 : vector<16x128xf32>
    %c0_1 = arith.constant 0 : index
    %c0_2 = arith.constant 0 : index
    %3 = vector.load %arg2[%c0_1, %c0_2] : memref<16x128xf32, #tpu.memory_space<vmem>>, vector<16x128xf32>
    tpu.vector_store %arg2[%c0_1, %c0_2], %2 {strides = array<i32>} : memref<16x128xf32, #tpu.memory_space<vmem>>, vector<16x128xf32>,
    return
  }
  func.func @transform_0(%arg0: i32) -> (i32, i32) {
    %c0_i32 = arith.constant 0 : i32
    %c0_i32_0 = arith.constant 0 : i32
    return %arg0, %c0_i32 : i32, i32
  }
  func.func @transform_1(%arg0: i32) -> (i32, i32) {
    %c0_i32 = arith.constant 0 : i32
    %c0_i32_0 = arith.constant 0 : i32
    return %arg0, %c0_i32 : i32, i32
  }
}

</mosaic_0001>

<bundles_post_ra>
// kernel: tpu_custom_call.1
= control target key start
LH: loop header
LB: loop body
LE: loop exit
PB: predicated region body
PF: predicated region fallthrough
CT: control target
= control target key end

     0   :  { %6 = vsyncpa [#allocation3], 0  ;;  %s136_s0 = inlined_call_operand.hbm [shape: f32[16,128], index: 0, kind: input, shape index: {}]   ;;  %s137_s1 = inlined_call_operand.hbm [shape: f32[16,128], index: 1, kind: output, shape index: {}]  }
   0x1   :  { %7 = vsyncpa [#allocation4], 0  ;;  %s98_s6 = smov [#allocation2]   ;;  %s50_s10 = scalar_lea.hbm %s136_s0, 256 }
   0x2   :  { %s13_s7 = sshll.u32 %s98_s6, 4  ;;  %p51_p0 = scmp.ne.s32.totalorder %s136_s0, %s50_s10  ;;  %s14_s7 = int_to_ptr.vmem [resolvable:$true] %s13_s7 }
   0x3   :  { %p54_p1 = scmp.lt.u32.totalorder %s50_s10, %s136_s0 }
   0x5   :  { %p56_p2 = pnand %p54_p1, %p51_p0 }
   0x7   :  { %59 = shalt.err (!%p56_p2)
}
   0x8   :  { %s60_s15 = scalar_lea.vmem %s14_s7, 256  ;;  %p65_p4 = scmp.lt.s32.totalorder %s14_s7, %s14_s7 }
   0x9   :  { %p61_p3 = scmp.ne.s32.totalorder %s14_s7, %s60_s15  ;;  %p66_p5 = scmp.lt.s32.totalorder %s60_s15, %s60_s15 }
   0xb   :  { %p67_p6 = por %p66_p5, %p65_p4 }
   0xd   :  { %p68_p7 = pnand %p67_p6, %p61_p3 }
   0xf   :  { %71 = shalt.err (!%p68_p7)
}
  0x10   :  { %s99_s16 = smov 128   ;;  %s100_s17 = smov 8  }
  0x11   :  { %19 = dma.hbm_to_vmem [thread:$0]  %s136_s0, 256, %s14_s7, [#allocation3], %s99_s16, %s99_s16, %s100_s17  }
  0x12   :  { %94 = dma.done.wait [#allocation3], 256  }
  0x13   :  { %95 = vsyncadd [#allocation3], 4294967040  ;;  %s101_s20 = smov [#allocation5]   ;;  %v23_v0 = vld [vmem:[#allocation2] sm:$0xff]  ;;  %v24_v1 = vld [vmem:[#allocation2 + $0x8] sm:$0xff] }
  0x14   :  { %s34_s21 = sshll.u32 %s101_s20, 4  ;;  %v25_v2 = vmul.f32 0.0, %v23_v0  ;;  %v26_v3 = vmul.f32 0.0, %v24_v1  ;;  %s35_s21 = int_to_ptr.vmem [resolvable:$true] %s34_s21 }
  0x15   :  { %s72_s22 = scalar_lea.vmem %s35_s21, 256  ;;  %p77_p9 = scmp.lt.s32.totalorder %s35_s21, %s35_s21 }
  0x16   :  { %27 = vst [vmem:[#allocation5] sm:$0xff] %v25_v2  ;;  %28 = vst [vmem:[#allocation5 + $0x8] sm:$0xff] %v26_v3  ;;  %p73_p8 = scmp.ne.s32.totalorder %s35_s21, %s72_s22  ;;  %p78_p10 = scmp.lt.s32.totalorder %s72_s22, %s72_s22 }
  0x18   :  { %p79_p11 = por %p78_p10, %p77_p9 }
  0x1a   :  { %p80_p12 = pnand %p79_p11, %p73_p8 }
  0x1c   :  { %83 = shalt.err (!%p80_p12)
}
  0x1d   :  { %s84_s24 = scalar_lea.hbm %s137_s1, 256 }
  0x1e   :  { %p85_p13 = scmp.ne.s32.totalorder %s137_s1, %s84_s24  ;;  %p88_p0 = scmp.lt.u32.totalorder %s84_s24, %s137_s1 }
  0x20   :  { %p90_p1 = pnand %p88_p0, %p85_p13 }
  0x22   :  { %93 = shalt.err (!%p90_p1)
}
  0x23   :  { %40 = dma.vmem_to_hbm [thread:$0]  %s35_s21, 256, %s137_s1, [#allocation4], %s99_s16, %s99_s16, %s100_s17  }
  0x24   :  { %96 = dma.done.wait [#allocation4], 256  }
  0x25   :  { %97 = vsyncadd [#allocation4], 4294967040 }
  0x26   :  { %44 = vsyncpa [#allocation3], 1 }
  0x27   :  { %45 = vsyncpa [#allocation4], 1 }

</bundles_post_ra>
